<compile_context>
chip_gen: v7x
topology: tpu7x:2x2x1
jax: 0.10.0
libtpu: 0.0.40
codegen_flags: <defaults>
</compile_context>

<pallas_src>
import numpy as np
import jax
import jax.numpy as jnp
from jax import lax
from jax.experimental import pallas as pl
from jax.experimental.pallas import tpu as pltpu


def _resolve_kernel_size(sigma: float, kernel_size) -> int:
    if kernel_size is None:
        kernel_size = int(max(np.round(sigma * 3) * 2 + 1, 3))
    return int(kernel_size)


def _gaussian_1d(kernel_size: int, sigma: float) -> np.ndarray:
    # Mirrors GaussianFilter._kernel
    xs = np.arange(kernel_size, dtype=np.float64)
    g = np.exp(-((xs - kernel_size // 2) ** 2) / (2.0 * sigma ** 2))
    return (g / g.sum()).astype(np.float32)


def _band_matrix(n_in: int, taps: np.ndarray, pad: int) -> np.ndarray:
    """Banded matrix M (n_out, n_in) with M[i, j] = taps[j - i + pad].

    Left-multiplication computes the 1D cross-correlation with zero padding folded in:
    out[i] = sum_t taps[t] * x[i + t - pad] (out-of-range x contributes 0).
    """
    k = len(taps)
    n_out = n_in + 2 * pad - k + 1
    m = np.zeros((n_out, n_in), dtype=np.float32)
    for i in range(n_out):
        for t in range(k):
            j = i + t - pad
            if 0 <= j < n_in:
                m[i, j] = float(taps[t])
    return m


def _block_footprint_bytes(p, H, W, OH, OW, in_item, out_item, cd_item):
    """Per-grid-step VMEM footprint: double-buffered I/O blocks + double-buffered band
    matrices + single-buffered in-kernel intermediates (input cast copy, f32 row-pass
    result + recast, broadcast bands, f32 column-pass result, output cast)."""
    bands = 2 * (OH * H + W * OW) * cd_item                    # double-buffered by default
    io = 2 * p * (H * W * in_item + OH * OW * out_item)        # double-buffered blocks
    interm = p * (H * W * cd_item                              # input cast copy (worst case)
                  + H * OW * 4                                 # y (f32 accumulate)
                  + H * OW * cd_item                           # y recast (bf16 path)
                  + (OH * H + W * OW) * cd_item                # broadcast band matrices
                  + OH * OW * 4                                # z (f32)
                  + OH * OW * out_item)                        # output cast copy
    return bands + io + interm


def _choose_planes_per_block(n_planes, footprint_fn, budget_bytes):
    """Largest divisor of n_planes whose per-step footprint fits the budget, preferring an
    even number of grid steps (v7x shards the parallel grid axis across 2 TensorCores),
    then >= 2 steps, then the largest block."""
    divisors = [d for d in range(1, n_planes + 1) if n_planes % d == 0]
    feasible = [d for d in divisors if footprint_fn(d) <= budget_bytes] or [1]

    def rank(d):
        steps = n_planes // d
        return (steps >= 2 and steps % 2 == 0, steps >= 2, d)

    return max(feasible, key=rank)


def gaussian_filter_pallas(x: jnp.ndarray, sigma: float, kernel_size: int = None, *,
                           precision=lax.Precision.DEFAULT,
                           vmem_budget_bytes: int = 40 << 20) -> jnp.ndarray:
    """Depthwise gaussian blur matching GaussianFilter.forward on NCHW float input.

    precision: MXU precision for the f32 path.  DEFAULT = single bf16 pass with f32
    accumulation (~1e-3 relative error, fastest); HIGHEST reproduces the f32 PyTorch
    conv numerics at ~6x the MXU passes.
    """
    K = _resolve_kernel_size(sigma, kernel_size)
    pad = (K - 1) // 2
    taps = _gaussian_1d(K, sigma)

    B, C, H, W = x.shape
    OH = H + 2 * pad - K + 1
    OW = W + 2 * pad - K + 1
    N = B * C

    # bf16 inputs stay bf16 on the MXU (single-pass, f32 accumulation); everything else
    # computes in f32.  TODO(synk): integer inputs would truncate on the final cast;
    # PyTorch conv2d only accepts float inputs, so only float dtypes are supported here.
    compute_dtype = jnp.bfloat16 if x.dtype == jnp.bfloat16 else jnp.float32
    needs_in_cast = np.dtype(x.dtype) != np.dtype(compute_dtype)
    needs_mid_cast = np.dtype(compute_dtype) != np.dtype(jnp.float32)

    # Static banded tap matrices (padding folded in): column pass Bv @ plane, row pass
    # (.) @ BhT.  Constant index_map -> they stay resident in VMEM.
    bv = jnp.asarray(_band_matrix(H, taps, pad), dtype=compute_dtype)      # (OH, H)
    bht = jnp.asarray(_band_matrix(W, taps, pad).T, dtype=compute_dtype)   # (W, OW)

    xr = x.reshape(N, H, W)                                    # collapse (B, C) -> N planes
    in_item = np.dtype(x.dtype).itemsize
    out_item = in_item
    cd_item = np.dtype(compute_dtype).itemsize

    footprint = lambda p: _block_footprint_bytes(p, H, W, OH, OW, in_item, out_item, cd_item)
    P = _choose_planes_per_block(N, footprint, vmem_budget_bytes)
    grid = (N // P,)
    # Explicit scoped-VMEM limit (scoped defaults: 16 MiB v5e / 32 MiB v6e,v7x); capped
    # below v7x's 64 MiB physical VMEM per TensorCore.
    vmem_limit = int(min(max(footprint(P) + (4 << 20), 32 << 20), 56 << 20))

    row_pass_as_single_matmul = (H % 8 == 0)   # (P,H,W)->(P*H,W) collapse is layout-trivial

    def blur_kernel(bv_ref, bht_ref, x_ref, o_ref):
        xb = x_ref[...]                                        # (P, H, W)
        if needs_in_cast:
            xb = xb.astype(compute_dtype)

        # Row pass.
        if row_pass_as_single_matmul:
            # ONE MXU matmul over all P planes: (P*H, W) @ (W, OW).
            y = jnp.dot(xb.reshape(P * H, W), bht_ref[...],
                        preferred_element_type=jnp.float32,
                        precision=precision).reshape(P, H, OW)
        else:
            # Sublane padding would make the collapse a relayout; use a batched matmul.
            bht_b = jnp.broadcast_to(bht_ref[...], (P, W, OW))
            y = jnp.einsum('phw,pwo->pho', xb, bht_b,
                           preferred_element_type=jnp.float32, precision=precision)
        if needs_mid_cast:
            y = y.astype(compute_dtype)

        # Column pass: batched matmul contracting H; broadcasting Bv over the plane axis
        # lands the result directly as (P, OH, OW) (no in-kernel transpose needed).
        bv_b = jnp.broadcast_to(bv_ref[...], (P, OH, H))
        z = jnp.einsum('pqh,pho->pqo', bv_b, y,
                       preferred_element_type=jnp.float32, precision=precision)
        # TODO(synk): for tiny crops (OW < 128) repack so the store lane axis is >=128
        # (e.g. P*OW on lanes) to avoid masked vst.msk partial stores.
        o_ref[...] = z.astype(o_ref.dtype)

    flops = 2 * N * (H * W * OW + OH * H * OW)
    bytes_accessed = N * (H * W * in_item + OH * OW * out_item) + (bv.size + bht.size) * cd_item

    out = pl.pallas_call(
        blur_kernel,
        out_shape=jax.ShapeDtypeStruct((N, OH, OW), x.dtype),
        grid_spec=pltpu.PrefetchScalarGridSpec(
            num_scalar_prefetch=0,
            grid=grid,
            in_specs=[
                # TODO(synk): mark the band matrices pipeline_mode=pl.Buffered(1) (constant
                # index_map, never re-fetched) to halve their resident footprint once
                # very large H/W on v7x makes that matter.
                pl.BlockSpec((OH, H), lambda n: (0, 0)),        # Bv  (stays resident)
                pl.BlockSpec((W, OW), lambda n: (0, 0)),        # BhT (stays resident)
                pl.BlockSpec((P, H, W), lambda n: (n, 0, 0)),   # block of P input planes
            ],
            out_specs=pl.BlockSpec((P, OH, OW), lambda n: (n, 0, 0)),
        ),
        compiler_params=pltpu.CompilerParams(
            dimension_semantics=("parallel",),
            vmem_limit_bytes=vmem_limit),
        cost_estimate=pl.CostEstimate(
            flops=flops, transcendentals=0, bytes_accessed=bytes_accessed),
    )(bv, bht, xr)
    # TODO(synk): for very large planes (>= ~1k x 1k) tile H/W into ~256-wide halo'd strips
    # with per-strip band matrices so redundant FLOPs and the band footprint stay bounded
    # and the kernel fits v7x's 64 MiB VMEM.
    return out.reshape(B, C, OH, OW)


def gaussian_filter_reference(x: jnp.ndarray, sigma: float, kernel_size: int = None) -> jnp.ndarray:
    """Pure-JAX reference (XLA conv), equivalent to the PyTorch F.conv2d call."""
    K = _resolve_kernel_size(sigma, kernel_size)
    pad = (K - 1) // 2
    g = _gaussian_1d(K, sigma)
    kernel2d = jnp.asarray(np.outer(g, g).astype(np.float32))
    C = x.shape[1]
    w = jnp.broadcast_to(kernel2d[None, None], (C, 1, K, K))   # depthwise (C, 1, K, K)
    return lax.conv_general_dilated(
        x, w, window_strides=(1, 1), padding=((pad, pad), (pad, pad)),
        dimension_numbers=("NCHW", "OIHW", "NCHW"), feature_group_count=C,
        precision=lax.Precision.HIGHEST)


if __name__ == "__main__":
    sigma = 1.0  # -> kernel_size = 7, padding = 3 (same spatial size out)
    B, C, H, W = 2, 4, 16, 16

    key = jax.random.PRNGKey(0)
    x = jax.random.normal(key, (B, C, H, W), dtype=jnp.float32)

    out = jax.block_until_ready(gaussian_filter_pallas(x, sigma))
    ref = jax.block_until_ready(gaussian_filter_reference(x, sigma))

    assert out.shape == ref.shape == (B, C, H, W)
    # Default MXU precision is a single bf16 pass with f32 accumulation (~1e-3 relative);
    # pass precision=lax.Precision.HIGHEST to gaussian_filter_pallas for 1e-5-level parity.
    np.testing.assert_allclose(np.asarray(out), np.asarray(ref), rtol=2e-2, atol=2e-2)

    print("KERNEL_OK")
</pallas_src>

<mosaic_0001>
module attributes {stable_mosaic.version = 11 : i64} {
  func.func @blur_kernel(%arg0: i32, %arg1: memref<16x16xf32, #tpu.memory_space<vmem>>, %arg2: memref<16x16xf32, #tpu.memory_space<vmem>>, %arg3: memref<4x16x16xf32, #tpu.memory_space<vmem>>, %arg4: memref<4x16x16xf32, #tpu.memory_space<vmem>>) attributes {dimension_semantics = [#tpu.dimension_semantics<parallel>], iteration_bounds = array<i64: 2>, scalar_prefetch = 0 : i64, scratch_operands = 0 : i64, tpu.core_type = #tpu.core_type<tc>, window_params = [{pipeline_mode = #tpu.pipeline_mode<synchronous>, transform_indices = @transform_0, window_bounds = array<i64: 16, 16>}, {pipeline_mode = #tpu.pipeline_mode<synchronous>, transform_indices = @transform_1, window_bounds = array<i64: 16, 16>}, {transform_indices = @transform_2, window_bounds = array<i64: 4, 16, 16>}, {transform_indices = @transform_3, window_bounds = array<i64: 4, 16, 16>}]} {
    %c0 = arith.constant 0 : index
    %c0_0 = arith.constant 0 : index
    %c0_1 = arith.constant 0 : index
    %0 = vector.load %arg3[%c0, %c0_0, %c0_1] : memref<4x16x16xf32, #tpu.memory_space<vmem>>, vector<4x16x16xf32>
    %1 = vector.shape_cast %0 : vector<4x16x16xf32> to vector<64x16xf32>
    %c0_2 = arith.constant 0 : index
    %c0_3 = arith.constant 0 : index
    %2 = vector.load %arg2[%c0_2, %c0_3] : memref<16x16xf32, #tpu.memory_space<vmem>>, vector<16x16xf32>
    %cst = arith.constant dense<0.000000e+00> : vector<64x16xf32>
    %3 = tpu.matmul %1, %2, %cst {dimension_numbers = #tpu.dot_dimension_numbers<[1], [0], [0], [1], [0, 0, 1, 1], [], []>} : vector<64x16xf32>, vector<16x16xf32>, vector<64x16xf32> -> vector<64x16xf32>
    %4 = vector.shape_cast %3 : vector<64x16xf32> to vector<4x16x16xf32>
    %c0_4 = arith.constant 0 : index
    %c0_5 = arith.constant 0 : index
    %5 = vector.load %arg1[%c0_4, %c0_5] : memref<16x16xf32, #tpu.memory_space<vmem>>, vector<16x16xf32>
    %6 = vector.shape_cast %5 : vector<16x16xf32> to vector<1x16x16xf32>
    %7 = vector.broadcast %6 : vector<1x16x16xf32> to vector<4x16x16xf32>
    "tpu.trace_start"() <{level = 10 : i32, message = "pqh,pho->pqo"}> : () -> ()
    %cst_6 = arith.constant dense<0.000000e+00> : vector<4x16x16xf32>
    %8 = tpu.matmul %7, %4, %cst_6 {dimension_numbers = #tpu.dot_dimension_numbers<[2], [1], [1], [2], [0, 0, 0, 1, 1, 2], [0], [0]>} : vector<4x16x16xf32>, vector<4x16x16xf32>, vector<4x16x16xf32> -> vector<4x16x16xf32>
    "tpu.trace_stop"() : () -> ()
    %c0_7 = arith.constant 0 : index
    %c0_8 = arith.constant 0 : index
    %c0_9 = arith.constant 0 : index
    %9 = vector.load %arg4[%c0_7, %c0_8, %c0_9] : memref<4x16x16xf32, #tpu.memory_space<vmem>>, vector<4x16x16xf32>
    tpu.vector_store %arg4[%c0_7, %c0_8, %c0_9], %8 {strides = array<i32>} : memref<4x16x16xf32, #tpu.memory_space<vmem>>, vector<4x16x16xf32>,
    return
  }
  func.func @transform_0(%arg0: i32) -> (i32, i32) {
    %c0_i32 = arith.constant 0 : i32
    %c0_i32_0 = arith.constant 0 : i32
    %c0_i32_1 = arith.constant 0 : i32
    return %c0_i32, %c0_i32_0 : i32, i32
  }
  func.func @transform_1(%arg0: i32) -> (i32, i32) {
    %c0_i32 = arith.constant 0 : i32
    %c0_i32_0 = arith.constant 0 : i32
    %c0_i32_1 = arith.constant 0 : i32
    return %c0_i32, %c0_i32_0 : i32, i32
  }
  func.func @transform_2(%arg0: i32) -> (i32, i32, i32) {
    %c0_i32 = arith.constant 0 : i32
    %c0_i32_0 = arith.constant 0 : i32
    %c0_i32_1 = arith.constant 0 : i32
    return %arg0, %c0_i32, %c0_i32_0 : i32, i32, i32
  }
  func.func @transform_3(%arg0: i32) -> (i32, i32, i32) {
    %c0_i32 = arith.constant 0 : i32
    %c0_i32_0 = arith.constant 0 : i32
    %c0_i32_1 = arith.constant 0 : i32
    return %arg0, %c0_i32, %c0_i32_0 : i32, i32, i32
  }
}

</mosaic_0001>

<bundles_post_ra>
// kernel: tpu_custom_call.1
= control target key start
LH: loop header
LB: loop body
LE: loop exit
PB: predicated region body
PF: predicated region fallthrough
CT: control target
= control target key end

     0   :  { %8 = vsyncpa [#allocation3], 0  ;;  %s1442_s0 = inlined_call_operand.hbm [shape: f32[16,16], index: 0, kind: input, shape index: {}]   ;;  %s1443_s1 = inlined_call_operand.hbm [shape: f32[16,16], index: 1, kind: input, shape index: {}]   ;;  %s1444_s2 = inlined_call_operand.hbm [shape: f32[8,16,16], index: 2, kind: input, shape index: {}]   ;;  %s1445_s3 = inlined_call_operand.hbm [shape: f32[8,16,16], index: 3, kind: output, shape index: {}]  }
   0x1   :  { %9 = vsyncpa [#allocation6], 0 }
   0x2   :  { %10 = vsyncpa [#allocation4], 0 }
   0x3   :  { %12 = vsyncpa [#allocation4 + $0x1], 0  ;;  %s1173_s12 = smov 0   ;;  %s1175_s13 = smov 0  }
   0x4   :  { %s1177_s14 = smov 0   ;;  %s1179_s15 = smov 0  }
   0x5 LB: > { %s1194_s16 = sadd.s32 4294967295, %s1143_s15   ;;  %s782_s17 = sadd.s32 4294967294, %s1143_s15   ;;  %s1143_s15 = sphi %s1179_s15, %s1473_s15   ;;  %s1139_s14 = sphi %s1177_s14, %s1472_s14   ;;  %s1135_s13 = sphi %s1175_s13, %s1471_s13   ;;  %s1131_s12 = sphi %s1173_s12, %s1470_s12  }
   0x6   : > { %s1198_s18 = sadd.s32 1, %s1143_s15   ;;  %s67_s19 = sadd.s32 1, %s1139_s14 }
   0x7   : > { %s64_s20 = ssub.s32 %s1143_s15, %s1198_s18  ;;  %p74_p0 = scmp.ne.s32.totalorder %s1139_s14, %s1135_s13 }
   0x8   : > { %p65_p1 = scmp.eq.s32.totalorder %s64_s20, 0  ;;  %p75_p2 = scmp.eq.s32.totalorder %s1143_s15, 0 }
   0x9   : > { %p80_p3 = scmp.ne.s32.totalorder %s1135_s13, %s1131_s12  ;;  %p1446_p4 = scmp.eq.s32.totalorder %s1194_s16, 0 }
   0xa   : > { %s1210_s21 = scalar_select %p65_p1, %s1139_s14, %s67_s19  }
   0xb   : > { %p1212_p5 = por %p75_p2, %p74_p0  ;;  %p1218_p6 = por %p1446_p4, %p80_p3 }
   0xc   : > { %p104_p7 = scmp.eq.s32.totalorder %s1194_s16, 1  ;;  %p110_p8 = scmp.eq.s32.totalorder %s782_s17, 1 }
   0xd   : > { %s1451_s22 = scalar_select %p1212_p5, 1, 0 }
   0xe   : > { %s1452_s23 = scalar_select %p1218_p6, 1, 0 }
   0xf   : > { %p783_p9 = scmp.ge.s32.totalorder %s1143_s15, 1  ;;  %p117_p10 = scmp.lt.s32.totalorder %s1143_s15, 3 }
  0x10   : > { %p1225_p11 = por %p104_p7, %p74_p0  ;;  %p1229_p12 = por %p110_p8, %p80_p3 }
  0x11   : > { %p1233_p13 = pnand %p783_p9, %p117_p10  ;;  %s1145_s27 = smov [#allocation2]  }
  0x12   : > { %s1453_s24 = scalar_select %p1225_p11, 1, 0 }
  0x13   : > { %s1454_s25 = scalar_select %p1229_p12, 1, 0 }
  0x14   : > { %s1455_s26 = scalar_select %p1233_p13, 1, 0 }
  0x15   : > { %p924_p1 = pneg %p1233_p13  ;;  %s129_s28 = sshll.u32 %s1145_s27, 4  ;;  %s130_s28 = int_to_ptr.vmem [resolvable:$true] %s129_s28 }
  0x16   : > { %s1146_s30 = smov [#allocation5]   ;;  %s983_s7 = scalar_lea.hbm %s1442_s0, 256 }
  0x17   : > { %p1241_p2 = pnand %p924_p1, %p1446_p4  ;;  %s142_s4 = sshll.u32 %s1146_s30, 4  ;;  %s143_s4 = int_to_ptr.vmem [resolvable:$true] %s142_s4 }
  0x18   : > { %p984_p7 = scmp.ne.s32.totalorder %s1442_s0, %s983_s7  ;;  %p990_p1 = scmp.lt.u32.totalorder %s983_s7, %s1442_s0 }
  0x19   : > { %p985_p8 = pneg %p1241_p2 }
  0x1b   : > { %p986_p9 = pnand %p985_p8, %p984_p7 }
  0x1d   : > { %p987_p10 = pneg %p986_p9 }
  0x1f   : > { %p992_p0 = pnand %p990_p1, %p987_p10 }
  0x21   : > { %995 = shalt.err (!%p992_p0)
}
  0x22   : > { %s996_s17 = scalar_lea.vmem %s130_s28, 256  ;;  %p1004_p11 = scmp.lt.s32.totalorder %s130_s28, %s130_s28 }
  0x23   : > { %p997_p4 = scmp.ne.s32.totalorder %s130_s28, %s996_s17  ;;  %p1005_p6 = scmp.lt.s32.totalorder %s996_s17, %s996_s17 }
  0x25   : > { %p999_p3 = pnand %p997_p4, %p985_p8  ;;  %p1006_p13 = por %p1005_p6, %p1004_p11 }
  0x27   : > { %p1000_p12 = pneg %p999_p3 }
  0x29   : > { %p1007_p5 = pnand %p1006_p13, %p1000_p12 }
  0x2b   : > { %1010 = shalt.err (!%p1007_p5)
}
  0x2c   : > { %s1147_s19 = smov 128   ;;  %s1148_s20 = smov 8  }
  0x2d   : > { %927 = dma.hbm_to_vmem [thread:$0]  (!%p1241_p2), %s1442_s0, 256, %s130_s28, [#allocation3], %s1147_s19, %s1147_s19, %s1148_s20  }
  0x2e   : > { %p1457_p4 = scmp.ne.s32.totalorder %s1451_s22, 0  ;;  %p1458_p0 = scmp.lt.s32.totalorder %s1143_s15, 2 }
  0x2f   : > { %s1011_s8 = scalar_lea.hbm %s1443_s1, 256 }
  0x30   : > { %p1276_p3 = pnand %p1458_p0, %p1457_p4  ;;  %p1012_p5 = scmp.ne.s32.totalorder %s1443_s1, %s1011_s8 }
  0x31   : > { %p1018_p12 = scmp.lt.u32.totalorder %s1011_s8, %s1443_s1 }
  0x32   : > { %s1459_s5 = scalar_select %p1276_p3, 1, 0 }
  0x33   : > { %p1014_p6 = pnand %p1012_p5, %p985_p8 }
  0x35   : > { %p1015_p11 = pneg %p1014_p6 }
  0x37   : > { %p1020_p13 = pnand %p1018_p12, %p1015_p11 }
  0x39   : > { %1023 = shalt.err (!%p1020_p13)
}
  0x3a   : > { %s1024_s11 = scalar_lea.vmem %s143_s4, 256  ;;  %p1032_p1 = scmp.lt.s32.totalorder %s143_s4, %s143_s4 }
  0x3b   : > { %p1025_p7 = scmp.ne.s32.totalorder %s143_s4, %s1024_s11  ;;  %p1033_p4 = scmp.lt.s32.totalorder %s1024_s11, %s1024_s11 }
  0x3d   : > { %p1027_p9 = pnand %p1025_p7, %p985_p8  ;;  %p1034_p0 = por %p1033_p4, %p1032_p1 }
  0x3f   : > { %p1028_p10 = pneg %p1027_p9 }
  0x41   : > { %p1035_p3 = pnand %p1034_p0, %p1028_p10 }
  0x43   : > { %1038 = shalt.err (!%p1035_p3)
}
  0x44   : > { %930 = dma.hbm_to_vmem [thread:$0]  (!%p1241_p2), %s1443_s1, 256, %s143_s4, [#allocation6], %s1147_s19, %s1147_s19, %s1148_s20  }
  0x45   : > { %s156_s30 = sand.u32 1, %s1143_s15   ;;  %s158_s6 = sand.u32 1, %s1139_s14  }
  0x46   : > { %s787_s7 = sshll.u32 %s158_s6, 6  ;;  %s819_s8 = sshll.u32 %s1143_s15, 10 }
  0x47   : > { %s1309_s29 = scalar_lea.hbm %s1444_s2, %s819_s8  ;;  %s160_s28 = scalar_lea.vmem [#allocation7], %s787_s7 }
  0x48   : > { %s168_s22 = sshll.u32 %s160_s28, 4  ;;  %s1313_s11 = scalar_lea.sflag [#allocation3], %s156_s30  ;;  %s1311_s22 = int_to_ptr.vmem [resolvable:$true] %s168_s22 }
  0x49   : > { %s1039_s4 = scalar_lea.hbm %s1309_s29, 1024  ;;  %p1460_p8 = scmp.ne.s32.totalorder %s1459_s5, 0 }
  0x4a   : > { %p1040_p2 = scmp.ne.s32.totalorder %s1309_s29, %s1039_s4  ;;  %s1044_s6 = scalar_lea.hbm %s1444_s2, 2048 }
  0x4b   : > { %p1041_p3 = pneg %p1460_p8  ;;  %p1045_p11 = scmp.lt.u32.totalorder %s1309_s29, %s1444_s2 }
  0x4c   : > { %p1046_p12 = scmp.lt.u32.totalorder %s1044_s6, %s1039_s4  ;;  %p1048_p7 = scmp.lt.u32.totalorder %s1039_s4, %s1309_s29 }
  0x4d   : > { %p1042_p5 = pnand %p1041_p3, %p1040_p2 }
  0x4e   : > { %p1047_p13 = por %p1046_p12, %p1045_p11 }
  0x4f   : > { %p1043_p6 = pneg %p1042_p5 }
  0x50   : > { %p1049_p9 = por %p1048_p7, %p1047_p13 }
  0x52   : > { %p1050_p10 = pnand %p1049_p9, %p1043_p6 }
  0x54   : > { %1053 = shalt.err (!%p1050_p10)
}
  0x55   : > { %s1054_s30 = scalar_lea.vmem %s1311_s22, 1024  ;;  %s1149_s7 = smov [#allocation7]  }
  0x56   : > { %p1055_p1 = scmp.ne.s32.totalorder %s1311_s22, %s1054_s30  ;;  %s1059_s10 = sshll.u32 %s1149_s7, 4  ;;  %s1060_s10 = int_to_ptr.vmem [resolvable:$false] %s1059_s10 }
  0x57   : > { %s1061_s28 = scalar_lea.vmem %s1060_s10, 2048  ;;  %p1062_p2 = scmp.lt.s32.totalorder %s1311_s22, %s1060_s10 }
  0x58   : > { %p1057_p4 = pnand %p1055_p1, %p1041_p3  ;;  %p1063_p5 = scmp.lt.s32.totalorder %s1061_s28, %s1054_s30 }
  0x5a   : > { %p1058_p0 = pneg %p1057_p4  ;;  %p1064_p11 = por %p1063_p5, %p1062_p2 }
  0x5c   : > { %p1065_p12 = pnand %p1064_p11, %p1058_p0 }
  0x5e   : > { %1068 = shalt.err (!%p1065_p12)
}
  0x5f   : > { %934 = dma.hbm_to_vmem [thread:$0]  (!%p1460_p8), %s1309_s29, 1024, %s1311_s22, %s1313_s11, %s1147_s19, %s1147_s19, %s1148_s20  }
  0x60   : > { %p1461_p3 = scmp.ne.s32.totalorder %s1455_s26, 0 }
  0x61   : > { %p1462_p6 = scmp.eq.s32.totalorder (!%p1461_p3), %s1194_s16, 0 }
  0x62   : > { %180 = sbr.rel (%p1461_p3) target bundleno = 580 (0x244), region = 32 }
  0x69   : > { %1114 = dma.done.wait (%p1462_p6), [#allocation3], 256   ;;  %p1463_p13 = pmov %p1462_p6 }
  0x6a   : > { %p1464_p7 = pmov %p1462_p6 }
  0x6b   : > { %1116 = vsyncadd (%p1463_p13), [#allocation3], 4294967040 }
  0x6c   : > { %1118 = dma.done.wait (%p1464_p7), [#allocation6], 256   ;;  %p1465_p9 = pmov %p1462_p6 }
  0x6d   : > { %s190_s19 = sand.u32 1, %s1194_s16   ;;  %s192_s20 = sand.u32 1, %s1135_s13  }
  0x6e   : > { %1120 = vsyncadd (%p1465_p9), [#allocation6], 4294967040  ;;  %s1358_s26 = sshll.u32 %s192_s20, 6  ;;  %s191_s5 = scalar_lea.sflag [#allocation3], %s190_s19 }
  0x6f   : > { %s194_s29 = scalar_lea.vmem [#allocation7], %s1358_s26  ;;  %p1466_p8 = scmp.ne.s32.totalorder %s1452_s23, 0 }
  0x71   : > { %1122 = dma.done.wait (%p1466_p8), %s191_s5, 1024  }
  0x72   : > { %1124 = vsyncadd (%p1466_p8), %s191_s5, 4294966272  ;;  %vm229_vm0 = vcmask 130048   ;;  %v227_v0 = vld [vmem:[#allocation5] sm:$0xff]  ;;  %v228_v1 = vld [vmem:[#allocation5 + $0x8] sm:$0xff]  ;;  %s216_s23 = scalar_lea.vmem [#allocation8], %s1358_s26  ;;  %s821_s11 = sshll.u32 %s1194_s16, 10 }
  0x73   : > { %v219_v2 = vld [vmem:[%s194_s29] sm:$0xff]  ;;  %v892_v3 = vpack.c.bf16 %v228_v1, %v227_v0  ;;  %v220_v4 = vld [vmem:[%s194_s29 + $0x8] sm:$0xff]  ;;  %v221_v5 = vld [vmem:[%s194_s29 + $0x10] sm:$0xff]  ;;  %s690_s22 = sshll.u32 %s216_s23, 4  ;;  %s1394_s27 = scalar_lea.hbm %s1445_s3, %s821_s11  ;;  %s1388_s22 = int_to_ptr.vmem [resolvable:$true] %s690_s22 }
  0x74   : > { %852 = vmatprep.mubr.msk.f32.mxu0 %vm229_vm0, %v219_v2  ;;  %v222_v6 = vld [vmem:[%s194_s29 + $0x18] sm:$0xff]  ;;  %v223_v7 = vld [vmem:[%s194_s29 + $0x20] sm:$0xff]  ;;  %v224_v8 = vld [vmem:[%s194_s29 + $0x28] sm:$0xff]  ;;  %s1400_s16 = scalar_lea.sflag [#allocation4], %s192_s20  ;;  %s1069_s6 = scalar_lea.vmem %s1388_s22, 1024 }
  0x75   : > { %893 = vmatprep.subr.bf16.mxu0 %v892_v3  ;;  %v225_v9 = vld [vmem:[%s194_s29 + $0x30] sm:$0xff]  ;;  %v226_v10 = vld [vmem:[%s194_s29 + $0x38] sm:$0xff]  ;;  %v359_v11 = vld [vmem:[#allocation2] sm:$0xff]  ;;  %p1070_p10 = scmp.ne.s32.totalorder %s1388_s22, %s1069_s6  ;;  %p1467_p1 = scmp.ne.s32.totalorder %s1453_s24, 0 }
  0x76   : > { %895 = vmatpush3.bf16.msra.mxu0 %v892_v3  ;;  %868 = vmatprep.mubr.msk.f32.mxu1 %vm229_vm0, %v359_v11  ;;  %v360_v17 = vld [vmem:[#allocation2 + $0x8] sm:$0xff]  ;;  %s1150_s8 = smov [#allocation8]  }
  0x77   : > { %p1071_p4 = pnand %p1070_p10, %p1467_p1  ;;  %s1073_s9 = sshll.u32 %s1150_s8, 4  ;;  %s1074_s9 = int_to_ptr.vmem [resolvable:$false] %s1073_s9 }
  0x78   : > { %s1075_s30 = scalar_lea.vmem %s1074_s9, 2048  ;;  %p1076_p2 = scmp.lt.s32.totalorder %s1388_s22, %s1074_s9 }
  0x79   : > { %853 = vmatmul.mubr.msk.f32.vlgmr.msra.gmra.mrb[0].mxu0 %vm229_vm0, %v220_v4  ;;  %p1072_p0 = pneg %p1071_p4  ;;  %p1077_p5 = scmp.lt.s32.totalorder %s1075_s30, %s1069_s6 }
  0x7a   : > { %855 = vmatprep.mubr.msk.f32.mxu0 %vm229_vm0, %v221_v5 }
  0x7b   : > { %p1078_p11 = por %p1077_p5, %p1076_p2 }
  0x7d   : > { %856 = vmatmul.mubr.msk.f32.gmra.mrb[2].mxu0 %vm229_vm0, %v222_v6  ;;  %p1079_p12 = pnand %p1078_p11, %p1072_p0 }
  0x7e   : > { %858 = vmatprep.mubr.msk.f32.mxu0 %vm229_vm0, %v223_v7 }
  0x81   : > { %859 = vmatmul.mubr.msk.f32.gmra.mrb[4].mxu0 %vm229_vm0, %v224_v8 }
  0x82   : > { %861 = vmatprep.mubr.msk.f32.mxu0 %vm229_vm0, %v225_v9 }
  0x85   : > { %862 = vmatmul.mubr.msk.f32.gmra.mrb[6].mxu0 %vm229_vm0, %v226_v10 }
 0x14c   : > { %v854_v12 = vpop.f32.mrb[0].mxu0 }
 0x14d   : > { %v320_v13 = vpop.f32.mrb[1].mxu0 }
 0x14e   : > { %v896_v14 = vpack.c.bf16 %v854_v12, %v320_v13 }
 0x150   : > { %v857_v15 = vpop.f32.mrb[2].mxu0  ;;  %897 = vmatprep.subr.bf16.mxu1 %v896_v14 }
 0x151   : > { %v330_v16 = vpop.f32.mrb[3].mxu0  ;;  %899 = vmatpush3.bf16.msra.mxu1 %v896_v14 }
 0x152   : > { %v900_v18 = vpack.c.bf16 %v857_v15, %v330_v16 }
 0x154   : > { %v860_v19 = vpop.f32.mrb[4].mxu0  ;;  %869 = vmatmul.mubr.msk.f32.vlgmr.msra.gmra.mrb[0].mxu1 %vm229_vm0, %v360_v17  ;;  %901 = vmatprep.subr.bf16.mxu1 %v900_v18 }
 0x155   : > { %v340_v20 = vpop.f32.mrb[5].mxu0  ;;  %903 = vmatpush3.bf16.msra.mxu1 %v900_v18  ;;  %875 = vmatprep.mubr.msk.f32.mxu1 %vm229_vm0, %v359_v11 }
 0x156   : > { %v904_v21 = vpack.c.bf16 %v860_v19, %v340_v20 }
 0x158   : > { %v863_v22 = vpop.f32.mrb[6].mxu0  ;;  %876 = vmatmul.mubr.msk.f32.vlgmr.msra.gmra.mrb[2].mxu1 %vm229_vm0, %v360_v17  ;;  %905 = vmatprep.subr.bf16.mxu1 %v904_v21 }
 0x159   : > { %v350_v23 = vpop.f32.mrb[7].mxu0  ;;  %907 = vmatpush3.bf16.msra.mxu1 %v904_v21  ;;  %882 = vmatprep.mubr.msk.f32.mxu1 %vm229_vm0, %v359_v11 }
 0x15a   : > { %v908_v24 = vpack.c.bf16 %v863_v22, %v350_v23 }
 0x15c   : > { %883 = vmatmul.mubr.msk.f32.vlgmr.msra.gmra.mrb[4].mxu1 %vm229_vm0, %v360_v17  ;;  %909 = vmatprep.subr.bf16.mxu1 %v908_v24 }
 0x15d   : > { %911 = vmatpush3.bf16.msra.mxu1 %v908_v24  ;;  %889 = vmatprep.mubr.msk.f32.mxu1 %vm229_vm0, %v359_v11 }
 0x160   : > { %890 = vmatmul.mubr.msk.f32.vlgmr.msra.gmra.mrb[6].mxu1 %vm229_vm0, %v360_v17 }
 0x227   : > { %v870_v25 = vpop.f32.mrb[0].mxu1 }
 0x228   : > { %668 = vst.msk [vmem:[%s216_s23 + $0x8] sm:$0xff] %vm229_vm0, %v870_v25  ;;  %v433_v26 = vpop.f32.mrb[1].mxu1 }
 0x229   : > { %667 = vst.msk [vmem:[%s216_s23] sm:$0xff] %vm229_vm0, %v433_v26 }
 0x22b   : > { %v877_v27 = vpop.f32.mrb[2].mxu1 }
 0x22c   : > { %670 = vst.msk [vmem:[%s216_s23 + $0x18] sm:$0xff] %vm229_vm0, %v877_v27  ;;  %v508_v28 = vpop.f32.mrb[3].mxu1 }
 0x22d   : > { %669 = vst.msk [vmem:[%s216_s23 + $0x10] sm:$0xff] %vm229_vm0, %v508_v28 }
 0x22f   : > { %v884_v29 = vpop.f32.mrb[4].mxu1 }
 0x230   : > { %672 = vst.msk [vmem:[%s216_s23 + $0x28] sm:$0xff] %vm229_vm0, %v884_v29  ;;  %v583_v30 = vpop.f32.mrb[5].mxu1 }
 0x231   : > { %671 = vst.msk [vmem:[%s216_s23 + $0x20] sm:$0xff] %vm229_vm0, %v583_v30 }
 0x233   : > { %v891_v31 = vpop.f32.mrb[6].mxu1 }
 0x234   : > { %674 = vst.msk [vmem:[%s216_s23 + $0x38] sm:$0xff] %vm229_vm0, %v891_v31  ;;  %v658_v32 = vpop.f32.mrb[7].mxu1 }
 0x235   : > { %673 = vst.msk [vmem:[%s216_s23 + $0x30] sm:$0xff] %vm229_vm0, %v658_v32 }
 0x236   : > { %1082 = shalt.err (!%p1079_p12)
}
 0x237   : > { %s1083_s7 = scalar_lea.hbm %s1394_s27, 1024  ;;  %s1087_s19 = scalar_lea.hbm %s1445_s3, 2048 }
 0x238   : > { %p1084_p3 = scmp.ne.s32.totalorder %s1394_s27, %s1083_s7  ;;  %p1088_p7 = scmp.lt.u32.totalorder %s1394_s27, %s1445_s3 }
 0x239   : > { %p1089_p9 = scmp.lt.u32.totalorder %s1087_s19, %s1083_s7  ;;  %p1091_p10 = scmp.lt.u32.totalorder %s1083_s7, %s1394_s27 }
 0x23a   : > { %p1085_p6 = pnand %p1084_p3, %p1467_p1 }
 0x23b   : > { %p1090_p8 = por %p1089_p9, %p1088_p7 }
 0x23c   : > { %p1086_p13 = pneg %p1085_p6 }
 0x23d   : > { %p1092_p4 = por %p1091_p10, %p1090_p8 }
 0x23f   : > { %p1093_p0 = pnand %p1092_p4, %p1086_p13 }
 0x241   : > { %1096 = shalt.err (!%p1093_p0)
}
 0x242   : > { %s1151_s5 = smov 128   ;;  %s1152_s29 = smov 8  }
 0x243   : > { %922 = dma.vmem_to_hbm [thread:$0]  (%p1467_p1), %s1388_s22, 1024, %s1394_s27, %s1400_s16, %s1151_s5, %s1151_s5, %s1152_s29  }
 0x244 PF: > { %s705_s23 = sand.u32 1, %s1131_s12   ;;  %p1468_p2 = scmp.ne.s32.totalorder %s1454_s25, 0 }
 0x245   : > { %p1469_p5 = scmp.ge.s32.totalorder %s1143_s15, 2  ;;  %s706_s11 = scalar_lea.sflag [#allocation4], %s705_s23 }
 0x247   : > { %p936_p11 = pnand %p1469_p5, %p1468_p2 }
 0x249   : > { %1126 = dma.done.wait (!%p936_p11), %s706_s11, 1024  }
 0x24a   : > { %1128 = vsyncadd (!%p936_p11), %s706_s11, 4294966272  ;;  %p15_p12 = scmp.ge.s32.totalorder %s1198_s18, 4   ;;  %s1470_s12 = smov %s1135_s13 }
 0x24b   : > { %s1471_s13 = smov %s1139_s14  ;;  %s1472_s14 = smov %s1210_s21 }
 0x24c   : > { %s1473_s15 = smov %s1198_s18  ;;  %17 = sbr.rel (!%p15_p12) target bundleno = 5 (0x5), region = 84 }
 0x253   :  { %711 = vsyncpa [#allocation3], 1 }
 0x254   :  { %713 = vsyncpa [#allocation3 + $0x1], 1 }
 0x255   :  { %714 = vsyncpa [#allocation6], 1 }
 0x256   :  { %715 = vsyncpa [#allocation4], 1 }
 0x257   :  { %717 = vsyncpa [#allocation4 + $0x1], 1 }

</bundles_post_ra>
